<compile_context>
chip_gen: v6e
topology: v6e:2x2x1
jax: 0.10.0
libtpu: 0.0.40
codegen_flags: <defaults>
</compile_context>

<pallas_src>
import jax
import jax.numpy as jnp
from jax import lax
from jax.experimental import pallas as pl
from jax.experimental.pallas import tpu as pltpu


def _round_up(x, m):
    return -(-x // m) * m


# ---------------------------------------------------------------------------
# Fused Dice-loss kernel
# ---------------------------------------------------------------------------
def _make_dice_kernel(C, R, HW, epsilon, softmax, needs_mask):
    """Kernel body for one (batch, spatial-chunk) grid point.

    Block shapes seen by the kernel:
      yhat_ref : (1, C, R, 128)  logits chunk (native dtype, cast in-kernel)
      y_ref    : (1, R, 128)     integer labels chunk
      o_ref    : (1, 1, 128)     per-batch loss (lane-broadcast), written at finalize
      acc_ref  : (R, 128) f32    partial intersection accumulator (lane/sublane dense)
      psum_ref : (R, 128) f32    partial prediction-sum (only used when softmax=False)
    """

    def kernel(yhat_ref, y_ref, o_ref, acc_ref, psum_ref):
        i = pl.program_id(1)

        @pl.when(i == 0)
        def _():
            acc_ref[...] = jnp.zeros_like(acc_ref)
            if not softmax:
                psum_ref[...] = jnp.zeros_like(psum_ref)

        lab = y_ref[0].astype(jnp.int32)                        # (R, 128)

        if needs_mask:
            row = lax.broadcasted_iota(jnp.int32, (R, 128), 0)
            lane = lax.broadcasted_iota(jnp.int32, (R, 128), 1)
            pos = (i * R + row) * 128 + lane
            valid = pos < HW

        if softmax:
            # numerically-stable softmax, unrolled over the (small, static) channel dim
            m = yhat_ref[0, 0].astype(jnp.float32)
            for c in range(1, C):
                m = jnp.maximum(m, yhat_ref[0, c].astype(jnp.float32))
            denom = jnp.zeros((R, 128), jnp.float32)
            e_lab = jnp.zeros((R, 128), jnp.float32)
            for c in range(C):
                ec = jnp.exp(yhat_ref[0, c].astype(jnp.float32) - m)   # EUP
                denom = denom + ec
                e_lab = jnp.where(lab == c, e_lab + ec, e_lab)
            # softmax probability of the true class == sum_c onehot * softmax
            contrib = e_lab / denom                              # (R, 128)
            if needs_mask:
                contrib = jnp.where(valid, contrib, 0.0)
            acc_ref[...] += contrib
        else:
            p_lab = jnp.zeros((R, 128), jnp.float32)
            p_sum = jnp.zeros((R, 128), jnp.float32)
            for c in range(C):
                pc = yhat_ref[0, c].astype(jnp.float32)
                p_sum = p_sum + pc
                p_lab = jnp.where(lab == c, p_lab + pc, p_lab)
            if needs_mask:
                p_lab = jnp.where(valid, p_lab, 0.0)
                p_sum = jnp.where(valid, p_sum, 0.0)
            acc_ref[...] += p_lab
            psum_ref[...] += p_sum

        @pl.when(i == pl.num_programs(1) - 1)
        def _():
            inter = jnp.sum(acc_ref[...])                        # one cross-lane reduce / batch
            if softmax:
                # sum_c softmax == 1 and sum_c onehot == 1 per pixel -> analytic union
                union = 2.0 * float(HW)
            else:
                union = jnp.sum(psum_ref[...]) + float(HW)
            dice = 2.0 * inter / (union + epsilon)
            o_ref[...] = jnp.full(o_ref.shape, 1.0 - dice, jnp.float32)

    return kernel


def dice_loss(y_hat, y, *, epsilon=1e-6, softmax=True,
              vmem_block_budget_bytes=8 * 1024 * 1024):
    """y_hat: (B, C, H, W) logits (NCHW, like PyTorch).  y: (B, H, W) integer labels."""
    B, C, H, W = y_hat.shape
    HW = H * W
    lg_bytes = jnp.dtype(y_hat.dtype).itemsize
    lb_bytes = jnp.dtype(y.dtype).itemsize

    # ---- derive the spatial tile (R sublane-rows of 128 lanes) from a VMEM budget
    nrows = -(-HW // 128)
    # per row-of-128: double-buffered logits + double-buffered labels + f32 accumulators
    per_row = 128 * (2 * C * lg_bytes + 2 * lb_bytes + 2 * 4)
    r_budget = max(8, (vmem_block_budget_bytes // per_row) // 8 * 8)
    if r_budget >= nrows:
        R, nchunks = nrows, 1
    else:
        nchunks = -(-nrows // r_budget)
        R = _round_up(-(-nrows // nchunks), 8)
        nchunks = -(-nrows // R)
    nrows_pad = nchunks * R
    hw_pad = nrows_pad * 128
    needs_mask = hw_pad != HW

    # ---- flatten spatial, pad the tail up to the tile grid (masked out in-kernel)
    yh = y_hat.reshape(B, C, HW)
    yl = y.reshape(B, HW)
    if needs_mask:
        yh = jnp.pad(yh, ((0, 0), (0, 0), (0, hw_pad - HW)))
        yl = jnp.pad(yl, ((0, 0), (0, hw_pad - HW)))
    yh = yh.reshape(B, C, nrows_pad, 128)
    yl = yl.reshape(B, nrows_pad, 128)

    kernel = _make_dice_kernel(C, R, HW, epsilon, softmax, needs_mask)

    per_batch = pl.pallas_call(
        kernel,
        out_shape=jax.ShapeDtypeStruct((B, 1, 128), jnp.float32),
        grid=(B, nchunks),
        in_specs=[
            pl.BlockSpec((1, C, R, 128), lambda b, i: (b, 0, i, 0)),
            pl.BlockSpec((1, R, 128), lambda b, i: (b, i, 0)),
        ],
        out_specs=pl.BlockSpec((1, 1, 128), lambda b, i: (b, 0, 0)),
        scratch_shapes=[
            pltpu.VMEM((R, 128), jnp.float32),   # intersection partials
            pltpu.VMEM((R, 128), jnp.float32),   # prediction-sum partials (softmax=False)
        ],
        compiler_params=pltpu.CompilerParams(
            dimension_semantics=("parallel", "arbitrary"),
            vmem_limit_bytes=32 * 1024 * 1024,
        ),
    )(yh, yl)

    # tiny epilogue in plain JAX: mean of per-batch losses
    return jnp.mean(per_batch[:, 0, 0])


# ---------------------------------------------------------------------------
# Pure-JAX reference (mirrors the PyTorch module) for correctness checking
# ---------------------------------------------------------------------------
def dice_loss_ref(y_hat, y, epsilon=1e-6, softmax=True):
    B, C = y_hat.shape[0], y_hat.shape[1]
    onehot = jax.nn.one_hot(y, C, axis=1, dtype=jnp.float32)
    p = jax.nn.softmax(y_hat.astype(jnp.float32), axis=1) if softmax else y_hat.astype(jnp.float32)
    yf = onehot.reshape(B, -1)
    pf = p.reshape(B, -1)
    inter = jnp.sum(yf * pf, axis=1)
    union = jnp.sum(yf, axis=1) + jnp.sum(pf, axis=1)
    dice = 2.0 * inter / (union + epsilon)
    return jnp.mean(1.0 - dice)


if __name__ == "__main__":
    key = jax.random.PRNGKey(0)
    k1, k2 = jax.random.split(key)

    B, C, H, W = 2, 4, 16, 16
    y_hat = jax.random.normal(k1, (B, C, H, W), jnp.float32)    # logits (NCHW)
    y = jax.random.randint(k2, (B, H, W), 0, C, jnp.int32)      # class labels

    loss = dice_loss(y_hat, y)
    jax.block_until_ready(loss)

    ref = dice_loss_ref(y_hat, y)
    assert loss.shape == (), loss.shape
    assert bool(jnp.isfinite(loss))
    assert bool(jnp.abs(loss - ref) < 1e-5), (float(loss), float(ref))
    print("KERNEL_OK")
</pallas_src>

<mosaic_0001>
module attributes {stable_mosaic.version = 11 : i64} {
  func.func @kernel(%arg0: i32, %arg1: i32, %arg2: memref<1x4x2x128xf32, #tpu.memory_space<vmem>>, %arg3: memref<1x2x128xi32, #tpu.memory_space<vmem>>, %arg4: memref<1x1x128xf32, #tpu.memory_space<vmem>>, %arg5: memref<2x128xf32, #tpu.memory_space<vmem>>, %arg6: memref<2x128xf32, #tpu.memory_space<vmem>>) attributes {dimension_semantics = [#tpu.dimension_semantics<parallel>, #tpu.dimension_semantics<arbitrary>], iteration_bounds = array<i64: 2, 1>, scalar_prefetch = 0 : i64, scratch_operands = 2 : i64, tpu.core_type = #tpu.core_type<tc>, window_params = [{transform_indices = @transform_0, window_bounds = array<i64: 1, 4, 2, 128>}, {transform_indices = @transform_1, window_bounds = array<i64: 1, 2, 128>}, {transform_indices = @transform_2, window_bounds = array<i64: 1, 1, 128>}]} {
    %c0_i32 = arith.constant 0 : i32
    %0 = arith.cmpi eq, %arg1, %c0_i32 : i32
    %1 = arith.extui %0 : i1 to i32
    %c0_i32_0 = arith.constant 0 : i32
    %2 = arith.cmpi ne, %1, %c0_i32_0 : i32
    scf.if %2 {
      %cst_40 = arith.constant 0.000000e+00 : f32
      %61 = vector.broadcast %cst_40 : f32 to vector<2x128xf32>
      %c0_41 = arith.constant 0 : index
      %c0_42 = arith.constant 0 : index
      %62 = vector.load %arg5[%c0_41, %c0_42] : memref<2x128xf32, #tpu.memory_space<vmem>>, vector<2x128xf32>
      tpu.vector_store %arg5[%c0_41, %c0_42], %61 {strides = array<i32>} : memref<2x128xf32, #tpu.memory_space<vmem>>, vector<2x128xf32>,
    } else {
    }
    %c0 = arith.constant 0 : index
    %c0_1 = arith.constant 0 : index
    %c0_2 = arith.constant 0 : index
    %3 = vector.load %arg3[%c0, %c0_1, %c0_2] : memref<1x2x128xi32, #tpu.memory_space<vmem>>, vector<1x2x128xi32>
    %4 = vector.shape_cast %3 : vector<1x2x128xi32> to vector<2x128xi32>
    %c0_3 = arith.constant 0 : index
    %c0_4 = arith.constant 0 : index
    %c0_5 = arith.constant 0 : index
    %c0_6 = arith.constant 0 : index
    %5 = vector.load %arg2[%c0_3, %c0_4, %c0_5, %c0_6] : memref<1x4x2x128xf32, #tpu.memory_space<vmem>>, vector<1x1x2x128xf32>
    %6 = vector.shape_cast %5 : vector<1x1x2x128xf32> to vector<2x128xf32>
    %c0_7 = arith.constant 0 : index
    %c1 = arith.constant 1 : index
    %c0_8 = arith.constant 0 : index
    %c0_9 = arith.constant 0 : index
    %7 = vector.load %arg2[%c0_7, %c1, %c0_8, %c0_9] : memref<1x4x2x128xf32, #tpu.memory_space<vmem>>, vector<1x1x2x128xf32>
    %8 = vector.shape_cast %7 : vector<1x1x2x128xf32> to vector<2x128xf32>
    %9 = arith.maximumf %6, %8 : vector<2x128xf32>
    %c0_10 = arith.constant 0 : index
    %c2 = arith.constant 2 : index
    %c0_11 = arith.constant 0 : index
    %c0_12 = arith.constant 0 : index
    %10 = vector.load %arg2[%c0_10, %c2, %c0_11, %c0_12] : memref<1x4x2x128xf32, #tpu.memory_space<vmem>>, vector<1x1x2x128xf32>
    %11 = vector.shape_cast %10 : vector<1x1x2x128xf32> to vector<2x128xf32>
    %12 = arith.maximumf %9, %11 : vector<2x128xf32>
    %c0_13 = arith.constant 0 : index
    %c3 = arith.constant 3 : index
    %c0_14 = arith.constant 0 : index
    %c0_15 = arith.constant 0 : index
    %13 = vector.load %arg2[%c0_13, %c3, %c0_14, %c0_15] : memref<1x4x2x128xf32, #tpu.memory_space<vmem>>, vector<1x1x2x128xf32>
    %14 = vector.shape_cast %13 : vector<1x1x2x128xf32> to vector<2x128xf32>
    %15 = arith.maximumf %12, %14 : vector<2x128xf32>
    %cst = arith.constant 0.000000e+00 : f32
    %16 = vector.broadcast %cst : f32 to vector<2x128xf32>
    %cst_16 = arith.constant 0.000000e+00 : f32
    %17 = vector.broadcast %cst_16 : f32 to vector<2x128xf32>
    %c0_17 = arith.constant 0 : index
    %c0_18 = arith.constant 0 : index
    %c0_19 = arith.constant 0 : index
    %c0_20 = arith.constant 0 : index
    %18 = vector.load %arg2[%c0_17, %c0_18, %c0_19, %c0_20] : memref<1x4x2x128xf32, #tpu.memory_space<vmem>>, vector<1x1x2x128xf32>
    %19 = vector.shape_cast %18 : vector<1x1x2x128xf32> to vector<2x128xf32>
    %20 = arith.subf %19, %15 : vector<2x128xf32>
    %21 = math.exp %20 : vector<2x128xf32>
    %22 = arith.addf %16, %21 : vector<2x128xf32>
    %c0_i32_21 = arith.constant 0 : i32
    %23 = vector.broadcast %c0_i32_21 : i32 to vector<2x128xi32>
    %24 = arith.cmpi eq, %4, %23 : vector<2x128xi32>
    %25 = arith.addf %17, %21 : vector<2x128xf32>
    %26 = arith.select %24, %25, %17 : vector<2x128xi1>, vector<2x128xf32>
    %c0_22 = arith.constant 0 : index
    %c1_23 = arith.constant 1 : index
    %c0_24 = arith.constant 0 : index
    %c0_25 = arith.constant 0 : index
    %27 = vector.load %arg2[%c0_22, %c1_23, %c0_24, %c0_25] : memref<1x4x2x128xf32, #tpu.memory_space<vmem>>, vector<1x1x2x128xf32>
    %28 = vector.shape_cast %27 : vector<1x1x2x128xf32> to vector<2x128xf32>
    %29 = arith.subf %28, %15 : vector<2x128xf32>
    %30 = math.exp %29 : vector<2x128xf32>
    %31 = arith.addf %22, %30 : vector<2x128xf32>
    %c1_i32 = arith.constant 1 : i32
    %32 = vector.broadcast %c1_i32 : i32 to vector<2x128xi32>
    %33 = arith.cmpi eq, %4, %32 : vector<2x128xi32>
    %34 = arith.addf %26, %30 : vector<2x128xf32>
    %35 = arith.select %33, %34, %26 : vector<2x128xi1>, vector<2x128xf32>
    %c0_26 = arith.constant 0 : index
    %c2_27 = arith.constant 2 : index
    %c0_28 = arith.constant 0 : index
    %c0_29 = arith.constant 0 : index
    %36 = vector.load %arg2[%c0_26, %c2_27, %c0_28, %c0_29] : memref<1x4x2x128xf32, #tpu.memory_space<vmem>>, vector<1x1x2x128xf32>
    %37 = vector.shape_cast %36 : vector<1x1x2x128xf32> to vector<2x128xf32>
    %38 = arith.subf %37, %15 : vector<2x128xf32>
    %39 = math.exp %38 : vector<2x128xf32>
    %40 = arith.addf %31, %39 : vector<2x128xf32>
    %c2_i32 = arith.constant 2 : i32
    %41 = vector.broadcast %c2_i32 : i32 to vector<2x128xi32>
    %42 = arith.cmpi eq, %4, %41 : vector<2x128xi32>
    %43 = arith.addf %35, %39 : vector<2x128xf32>
    %44 = arith.select %42, %43, %35 : vector<2x128xi1>, vector<2x128xf32>
    %c0_30 = arith.constant 0 : index
    %c3_31 = arith.constant 3 : index
    %c0_32 = arith.constant 0 : index
    %c0_33 = arith.constant 0 : index
    %45 = vector.load %arg2[%c0_30, %c3_31, %c0_32, %c0_33] : memref<1x4x2x128xf32, #tpu.memory_space<vmem>>, vector<1x1x2x128xf32>
    %46 = vector.shape_cast %45 : vector<1x1x2x128xf32> to vector<2x128xf32>
    %47 = arith.subf %46, %15 : vector<2x128xf32>
    %48 = math.exp %47 : vector<2x128xf32>
    %49 = arith.addf %40, %48 : vector<2x128xf32>
    %c3_i32 = arith.constant 3 : i32
    %50 = vector.broadcast %c3_i32 : i32 to vector<2x128xi32>
    %51 = arith.cmpi eq, %4, %50 : vector<2x128xi32>
    %52 = arith.addf %44, %48 : vector<2x128xf32>
    %53 = arith.select %51, %52, %44 : vector<2x128xi1>, vector<2x128xf32>
    %54 = arith.divf %53, %49 : vector<2x128xf32>
    %c0_34 = arith.constant 0 : index
    %c0_35 = arith.constant 0 : index
    %55 = vector.load %arg5[%c0_34, %c0_35] : memref<2x128xf32, #tpu.memory_space<vmem>>, vector<2x128xf32>
    %56 = arith.addf %55, %54 : vector<2x128xf32>
    %c0_36 = arith.constant 0 : index
    %c0_37 = arith.constant 0 : index
    %57 = vector.load %arg5[%c0_36, %c0_37] : memref<2x128xf32, #tpu.memory_space<vmem>>, vector<2x128xf32>
    tpu.vector_store %arg5[%c0_36, %c0_37], %56 {strides = array<i32>} : memref<2x128xf32, #tpu.memory_space<vmem>>, vector<2x128xf32>,
    %c0_i32_38 = arith.constant 0 : i32
    %58 = arith.cmpi eq, %arg1, %c0_i32_38 : i32
    %59 = arith.extui %58 : i1 to i32
    %c0_i32_39 = arith.constant 0 : i32
    %60 = arith.cmpi ne, %59, %c0_i32_39 : i32
    scf.if %60 {
      %c0_40 = arith.constant 0 : index
      %c0_41 = arith.constant 0 : index
      %61 = vector.load %arg5[%c0_40, %c0_41] : memref<2x128xf32, #tpu.memory_space<vmem>>, vector<2x128xf32>
      %62 = vector.shape_cast %61 : vector<2x128xf32> to vector<1x2x128xf32>
      %cst_42 = arith.constant dense<0.000000e+00> : vector<1xf32>
      %63 = vector.multi_reduction <add>, %62, %cst_42 [1, 2] : vector<1x2x128xf32> to vector<1xf32>
      %64 = vector.shape_cast %63 : vector<1xf32> to vector<1x1x1xf32>
      %65 = vector.extract %64[0, 0, 0] : f32 from vector<1x1x1xf32>
      %cst_43 = arith.constant 2.000000e+00 : f32
      %66 = arith.mulf %cst_43, %65 : f32
      %cst_44 = arith.constant 5.120000e+02 : f32
      %67 = arith.divf %66, %cst_44 : f32
      %cst_45 = arith.constant 1.000000e+00 : f32
      %68 = arith.subf %cst_45, %67 : f32
      %69 = vector.broadcast %68 : f32 to vector<1x1x128xf32>
      %c0_46 = arith.constant 0 : index
      %c0_47 = arith.constant 0 : index
      %c0_48 = arith.constant 0 : index
      %70 = vector.load %arg4[%c0_46, %c0_47, %c0_48] : memref<1x1x128xf32, #tpu.memory_space<vmem>>, vector<1x1x128xf32>
      tpu.vector_store %arg4[%c0_46, %c0_47, %c0_48], %69 {strides = array<i32>} : memref<1x1x128xf32, #tpu.memory_space<vmem>>, vector<1x1x128xf32>,
    } else {
    }
    return
  }
  func.func @transform_0(%arg0: i32, %arg1: i32) -> (i32, i32, i32, i32) {
    %c0_i32 = arith.constant 0 : i32
    %c0_i32_0 = arith.constant 0 : i32
    %c0_i32_1 = arith.constant 0 : i32
    return %arg0, %c0_i32, %arg1, %c0_i32_0 : i32, i32, i32, i32
  }
  func.func @transform_1(%arg0: i32, %arg1: i32) -> (i32, i32, i32) {
    %c0_i32 = arith.constant 0 : i32
    %c0_i32_0 = arith.constant 0 : i32
    return %arg0, %arg1, %c0_i32 : i32, i32, i32
  }
  func.func @transform_2(%arg0: i32, %arg1: i32) -> (i32, i32, i32) {
    %c0_i32 = arith.constant 0 : i32
    %c0_i32_0 = arith.constant 0 : i32
    %c0_i32_1 = arith.constant 0 : i32
    return %arg0, %c0_i32, %c0_i32_0 : i32, i32, i32
  }
}

</mosaic_0001>

<bundles_post_ra>
// kernel: tpu_custom_call.1
= control target key start
LH: loop header
LB: loop body
LE: loop exit
PB: predicated region body
PF: predicated region fallthrough
CT: control target
= control target key end

     0   :  { %7 = vsyncpa [#allocation5], 0  ;;  %s832_s0 = inlined_call_operand.hbm [shape: f32[2,4,2,128], index: 0, kind: input, shape index: {}]   ;;  %s833_s1 = inlined_call_operand.hbm [shape: s32[2,2,128], index: 1, kind: input, shape index: {}]   ;;  %s834_s2 = inlined_call_operand.hbm [shape: f32[2,1,128], index: 2, kind: output, shape index: {}]  }
   0x1   :  { %9 = vsyncpa [#allocation5 + $0x1], 0 }
   0x2   :  { %10 = vsyncpa [#allocation8], 0 }
   0x3   :  { %12 = vsyncpa [#allocation8 + $0x1], 0 }
   0x4   :  { %13 = vsyncpa [#allocation6], 0 }
   0x5   :  { %15 = vsyncpa [#allocation6 + $0x1], 0  ;;  %s663_s9 = smov 0   ;;  %s665_s10 = smov 0  }
   0x6   :  { %s667_s11 = smov 0   ;;  %s669_s12 = smov 0  }
   0x7   :  { %s671_s13 = smov 0   ;;  %s673_s14 = smov 0  }
   0x8 LB: > { %s399_s15 = sadd.s32 4294967295, %s640_s14   ;;  %s400_s16 = sadd.s32 4294967294, %s640_s14   ;;  %s640_s14 = sphi %s673_s14, %s21_s14   ;;  %s636_s13 = sphi %s671_s13, %s845_s13   ;;  %s632_s12 = sphi %s669_s12, %s844_s12   ;;  %s628_s11 = sphi %s667_s11, %s843_s11   ;;  %s624_s10 = sphi %s665_s10, %s842_s10   ;;  %s620_s9 = sphi %s663_s9, %s841_s9  }
   0x9   : > { %s33_s17 = sadd.s32 1, %s636_s13  ;;  %s42_s18 = sadd.s32 1, %s628_s11 }
   0xa   : > { %p35_p0 = scmp.ge.s32.totalorder %s33_s17, 2  ;;  %p49_p1 = scmp.ne.s32.totalorder %s628_s11, %s624_s10 }
   0xb   : > { %p50_p2 = scmp.eq.s32.totalorder %s640_s14, 0  ;;  %p55_p3 = scmp.ne.s32.totalorder %s624_s10, %s620_s9 }
   0xc   : > { %s847_s17 = smov (%p35_p0, %s33_s17), 0  ;;  %p56_p5 = scmp.eq.s32.totalorder %s399_s15, 0 }
   0xd   : > { %p704_p4 = por %p50_p2, %p49_p1  ;;  %s37_s20 = ssub.s32 %s636_s13, %s847_s17 }
   0xe   : > { %p107_p6 = scmp.eq.s32.totalorder %s399_s15, 1  ;;  %p40_p7 = scmp.eq.s32.totalorder %s37_s20, 0 }
   0xf   : > { %p710_p8 = por %p56_p5, %p55_p3  ;;  %p113_p10 = scmp.eq.s32.totalorder %s400_s16, 1 }
  0x10   : > { %p714_p9 = por %p107_p6, %p49_p1  ;;  %p402_p12 = scmp.ge.s32.totalorder %s640_s14, 2 }
  0x11   : > { %s719_s23 = scalar_select %p40_p7, %s628_s11, %s42_s18  }
  0x12   : > { %p721_p11 = por %p113_p10, %p55_p3  ;;  %p437_p13 = scmp.lt.s32.totalorder %s640_s14, 2 }
  0x13   : > { %s728_s25 = sand.u32 1, %s628_s11   ;;  %s417_s27 = sshll.u32 %s636_s13, 7 }
  0x14   : > { %s403_s26 = sshll.u32 %s728_s25, 3  ;;  %s144_s30 = scalar_lea.hbm %s832_s0, %s417_s27 }
  0x15   : > { %s137_s3 = scalar_lea.vmem [#allocation4], %s403_s26  ;;  %p737_p0 = pnand %p437_p13, %p704_p4 }
  0x16   : > { %s145_s4 = sshll.u32 %s137_s3, 4  ;;  %p408_p1 = scmp.ge.s32.totalorder %s640_s14, 1  ;;  %s146_s4 = int_to_ptr.vmem [resolvable:$true] %s145_s4 }
  0x17   : > { %s134_s6 = scalar_lea.sflag [#allocation5], %s728_s25  ;;  %p502_p2 = pneg %p737_p0 }
  0x18   : > { %s513_s7 = scalar_lea.vmem %s146_s4, 128  ;;  %s642_s8 = smov [#allocation4]  }
  0x19   : > { %p514_p3 = scmp.ne.s32.totalorder %s146_s4, %s513_s7  ;;  %s518_s15 = sshll.u32 %s642_s8, 4  ;;  %s519_s15 = int_to_ptr.vmem [resolvable:$false] %s518_s15 }
  0x1a   : > { %s520_s16 = scalar_lea.vmem %s519_s15, 256  ;;  %p521_p4 = scmp.lt.s32.totalorder %s146_s4, %s519_s15 }
  0x1b   : > { %p516_p5 = pnand %p514_p3, %p502_p2  ;;  %p522_p7 = scmp.lt.s32.totalorder %s520_s16, %s513_s7 }
  0x1d   : > { %p517_p6 = pneg %p516_p5  ;;  %p523_p10 = por %p522_p7, %p521_p4 }
  0x1f   : > { %p524_p13 = pnand %p523_p10, %p517_p6 }
  0x21   : > { %527 = shalt.err (!%p524_p13)
}
  0x22   : > { %s643_s18 = smov 32   ;;  %s644_s19 = smov 2  }
  0x23   : > { %429 = dma.hbm_to_vmem [thread:$0]  (!%p737_p0), %s144_s30, 128, %s146_s4, %s134_s6, %s643_s18, %s643_s18, %s644_s19  }
  0x24   : > { %p172_p3 = scmp.lt.s32.totalorder %s640_s14, 3  ;;  %s406_s20 = sshll.u32 %s728_s25, 1 }
  0x25   : > { %s407_s26 = sshll.u32 %s636_s13, 5  ;;  %s159_s7 = scalar_lea.vmem [#allocation7], %s406_s20 }
  0x26   : > { %p755_p5 = pnand %p408_p1, %p172_p3  ;;  %s165_s3 = scalar_lea.hbm %s833_s1, %s407_s26 }
  0x27   : > { %s167_s8 = sshll.u32 %s159_s7, 4  ;;  %s156_s15 = scalar_lea.sflag [#allocation8], %s728_s25  ;;  %s168_s8 = int_to_ptr.vmem [resolvable:$true] %s167_s8 }
  0x28   : > { %s541_s16 = scalar_lea.vmem %s168_s8, 32  ;;  %s645_s30 = smov [#allocation7]  }
  0x29   : > { %p542_p6 = scmp.ne.s32.totalorder %s168_s8, %s541_s16  ;;  %s546_s4 = sshll.u32 %s645_s30, 4  ;;  %s547_s4 = int_to_ptr.vmem [resolvable:$false] %s546_s4 }
  0x2a   : > { %s548_s6 = scalar_lea.vmem %s547_s4, 64  ;;  %p549_p1 = scmp.lt.s32.totalorder %s168_s8, %s547_s4 }
  0x2b   : > { %p544_p4 = pnand %p542_p6, %p502_p2  ;;  %p550_p10 = scmp.lt.s32.totalorder %s548_s6, %s541_s16 }
  0x2d   : > { %p545_p7 = pneg %p544_p4  ;;  %p551_p13 = por %p550_p10, %p549_p1 }
  0x2f   : > { %p552_p3 = pnand %p551_p13, %p545_p7 }
  0x31   : > { %555 = shalt.err (!%p552_p3)
}
  0x32   : > { %432 = dma.hbm_to_vmem [thread:$0]  (!%p737_p0), %s165_s3, 32, %s168_s8, %s156_s15  }
  0x33   : > { %176 = sbr.rel (%p755_p5) target bundleno = 339 (0x153), region = 28  ;;  %s771_s25 = sand.u32 (!%p755_p5), 1, %s624_s10  }
  0x34   : > { %s409_s18 = sshll.u32 (!%p755_p5), %s771_s25, 3  ;;  %s179_s19 = scalar_lea.sflag (!%p755_p5), [#allocation5], %s771_s25 }
  0x35   : > { %s182_s20 = scalar_lea.vmem (!%p755_p5), [#allocation4], %s409_s18 }
  0x38   : > { %607 = dma.done.wait (%p710_p8), %s179_s19, 128  }
  0x39   : > { %609 = vsyncadd (%p710_p8), %s179_s19, 4294967168  ;;  %s410_s5 = sshll.u32 %s771_s25, 1  ;;  %s188_s26 = scalar_lea.sflag [#allocation8], %s771_s25 }
  0x3a   : > { %s191_s27 = scalar_lea.vmem [#allocation7], %s410_s5 }
  0x3b   : > { %611 = dma.done.wait (%p710_p8), %s188_s26, 32  }
  0x3c   : > { %613 = vsyncadd (%p710_p8), %s188_s26, 4294967264  ;;  %v646_v0 = vmov 0.0   ;;  %v222_v1 = vld [vmem:[%s182_s20] sm:$0x3]  ;;  %v411_v2 = vld [vmem:[%s182_s20 + $0x2] sm:$0x3] }
  0x3d   : > { %220 = vst [vmem:[#allocation2] sm:$0x3] %v646_v0  ;;  %v225_v3 = vmax.f32 %v222_v1, %v411_v2  ;;  %v412_v4 = vld [vmem:[%s182_s20 + $0x4] sm:$0x3]  ;;  %v413_v5 = vld [vmem:[%s182_s20 + $0x6] sm:$0x3] }
  0x3e   : > { %v221_v16 = vld [vmem:[%s191_s27] sm:$0x3]  ;;  %vm268_vm4 = vcmask 1041408   ;;  %s414_s29 = sshll.u32 %s632_s12, 4  ;;  %s215_s7 = scalar_lea.vmem [#allocation9], %s771_s25 }
  0x3f   : > { %v228_v6 = vmax.f32 %v225_v3, %v412_v4  ;;  %vm236_vm0 = vcmp.eq.s32.totalorder %v221_v16, 0  ;;  %vm242_vm1 = vcmp.eq.s32.totalorder %v221_v16, 1  ;;  %vm249_vm2 = vcmp.eq.s32.totalorder %v221_v16, 2  ;;  %s299_s8 = sshll.u32 %s215_s7, 4  ;;  %s790_s4 = scalar_lea.hbm %s834_s2, %s414_s29  ;;  %s300_s8 = int_to_ptr.vmem [resolvable:$true] %s299_s8 }
  0x40   : > { %vm256_vm3 = vcmp.eq.s32.totalorder %v221_v16, 3  ;;  %s287_s6 = scalar_lea.sflag [#allocation6], %s771_s25  ;;  %s556_s18 = scalar_lea.vmem %s300_s8, 16 }
  0x41   : > { %v231_v7 = vmax.f32 %v228_v6, %v413_v5  ;;  %p557_p8 = scmp.ne.s32.totalorder %s300_s8, %s556_s18  ;;  %s647_s19 = smov [#allocation9]  }
  0x42   : > { %s560_s12 = sshll.u32 %s647_s19, 4  ;;  %s561_s12 = int_to_ptr.vmem [resolvable:$false] %s560_s12 }
  0x43   : > { %v232_v8 = vsub.f32 %v222_v1, %v231_v7  ;;  %v238_v9 = vsub.f32 %v411_v2, %v231_v7  ;;  %v245_v10 = vsub.f32 %v412_v4, %v231_v7  ;;  %v252_v11 = vsub.f32 %v413_v5, %v231_v7  ;;  %p558_p0 = pnand %p557_p8, %p714_p9  ;;  %s562_s20 = scalar_lea.vmem %s561_s12, 32 }
  0x44   : > { %v261_v32 = vld [vmem:[#allocation2] sm:$0x3]  ;;  %p563_p5 = scmp.lt.s32.totalorder %s300_s8, %s561_s12  ;;  %p564_p6 = scmp.lt.s32.totalorder %s562_s20, %s556_s18 }
  0x45   : > { %v233_v12 = vmul.f32 1.442695, %v232_v8  ;;  %v239_v13 = vmul.f32 1.442695, %v238_v9  ;;  %v246_v14 = vmul.f32 1.442695, %v245_v10  ;;  %p559_p2 = pneg %p558_p0 }
  0x46   : > { %v253_v15 = vmul.f32 1.442695, %v252_v11  ;;  %p565_p4 = por %p564_p6, %p563_p5 }
  0x47   : > { %490 = vpow2.f32 %v233_v12 }
  0x48   : > { %492 = vpow2.f32 %v239_v13  ;;  %p566_p7 = pnand %p565_p4, %p559_p2 }
  0x49   : > { %494 = vpow2.f32 %v246_v14 }
  0x4a   : > { %496 = vpow2.f32 %v253_v15 }
  0x54   : > { %v491_v17 = vpop.eup %490 }
  0x55   : > { %v493_v18 = vpop.eup %492  ;;  %v237_v19 = vsel %vm236_vm0, %v491_v17, 0.0 }
  0x56   : > { %v495_v20 = vpop.eup %494  ;;  %v241_v21 = vadd.f32 %v493_v18, %v491_v17  ;;  %v243_v22 = vadd.f32 %v493_v18, %v237_v19 }
  0x57   : > { %v497_v23 = vpop.eup %496 }
  0x58   : > { %v248_v24 = vadd.f32 %v495_v20, %v241_v21  ;;  %v244_v25 = vsel %vm242_vm1, %v243_v22, %v237_v19 }
  0x59   : > { %v250_v27 = vadd.f32 %v495_v20, %v244_v25 }
  0x5a   : > { %v255_v26 = vadd.f32 %v497_v23, %v248_v24 }
  0x5b   : > { %v251_v28 = vsel %vm249_vm2, %v250_v27, %v244_v25 }
  0x5c   : > { %498 = vrcp.f32 %v255_v26  ;;  %v257_v29 = vadd.f32 %v497_v23, %v251_v28 }
  0x5e   : > { %v258_v30 = vsel %vm256_vm3, %v257_v29, %v251_v28 }
  0x69   : > { %v499_v31 = vpop.eup %498 }
  0x6a   : > { %v260_v33 = vmul.f32 %v499_v31, %v258_v30 }
  0x6c   : > { %v262_v34 = vadd.f32 %v261_v32, %v260_v33 }
  0x6e   : > { %263 = vst [vmem:[#allocation2] sm:$0x3] %v262_v34 }
  0x75   : > { %v267_v35 = vld [vmem:[#allocation2] sm:$0x3] }
  0x76   : > { %v269_v36 = vsel %vm268_vm4, %v267_v35, 0.0 }
  0x77   : > { %270 = vadd.xlane.f32.xlu0 %v269_v36 }
 0x100   : > { %v271_v37 = vpop.xlane.xlu0 %270 }
 0x101   : > { %v272_v38 = vrot.slane %v271_v37, 4 }
 0x103   : > { %v273_v39 = vadd.f32 %v272_v38, %v271_v37 }
 0x105   : > { %v274_v40 = vrot.slane %v273_v39, 2 }
 0x107   : > { %v275_v41 = vadd.f32 %v274_v40, %v273_v39 }
 0x109   : > { %v276_v42 = vrot.slane %v275_v41, 1 }
 0x10b   : > { %v277_v43 = vadd.f32 %v276_v42, %v275_v41 }
 0x10d   : > { %418 = vpush %v277_v43 }
 0x13e   : > { %s419_s21 = spop %418 }
 0x13f   : > { %s279_s28 = smul.f32 2.0, %s419_s21 }
 0x141   : > { %s282_s3 = smul.f32 0.001953125, %s279_s28 }
 0x143   : > { %s283_s15 = ssub.f32 1.0, %s282_s3 }
 0x145   : > { %v284_v44 = vstv %s283_s15 }
 0x146   : > { %285 = vst [vmem:[%s215_s7] sm:$0x1] %v284_v44 }
 0x147   : > { %569 = shalt.err (!%p566_p7)
}
 0x148   : > { %s570_s5 = scalar_lea.hbm %s790_s4, 16  ;;  %s574_s27 = scalar_lea.hbm %s834_s2, 32 }
 0x149   : > { %p571_p1 = scmp.ne.s32.totalorder %s790_s4, %s570_s5  ;;  %p575_p3 = scmp.lt.s32.totalorder %s790_s4, %s834_s2 }
 0x14a   : > { %p576_p8 = scmp.lt.s32.totalorder %s574_s27, %s570_s5 }
 0x14b   : > { %p572_p10 = pnand %p571_p1, %p714_p9 }
 0x14c   : > { %p577_p0 = por %p576_p8, %p575_p3 }
 0x14d   : > { %p573_p13 = pneg %p572_p10 }
 0x14f   : > { %p578_p2 = pnand %p577_p0, %p573_p13 }
 0x151   : > { %581 = shalt.err (!%p578_p2)
}
 0x152   : > { %424 = dma.vmem_to_hbm [thread:$0]  (%p714_p9), %s300_s8, 16, %s790_s4, %s287_s6  }
 0x153 PF: > { %s311_s29 = sand.u32 1, %s620_s9   ;;  %p434_p5 = pnand %p402_p12, %p721_p11 }
 0x154   : > { %s312_s3 = scalar_lea.sflag [#allocation6], %s311_s29 }
 0x155   : > { %p435_p6 = pneg %p434_p5 }
 0x157   : > { %615 = dma.done.wait (%p435_p6), %s312_s3, 16  }
 0x158   : > { %617 = vsyncadd (%p435_p6), %s312_s3, 4294967280  ;;  %s21_s14 = sadd.s32 1, %s640_s14   ;;  %s841_s9 = smov %s624_s10 }
 0x159   : > { %p18_p4 = scmp.ge.s32.totalorder %s21_s14, 4   ;;  %s842_s10 = smov %s628_s11 }
 0x15a   : > { %s843_s11 = smov %s719_s23  ;;  %s844_s12 = smov %s636_s13 }
 0x15b   : > { %s845_s13 = smov %s847_s17  ;;  %20 = sbr.rel (!%p18_p4) target bundleno = 8 (0x8), region = 97 }
 0x160   :  { %316 = vsyncpa [#allocation5], 1 }
 0x161   :  { %318 = vsyncpa [#allocation5 + $0x1], 1 }
 0x162   :  { %319 = vsyncpa [#allocation8], 1 }
 0x163   :  { %321 = vsyncpa [#allocation8 + $0x1], 1 }
 0x164   :  { %322 = vsyncpa [#allocation6], 1 }
 0x165   :  { %324 = vsyncpa [#allocation6 + $0x1], 1 }

</bundles_post_ra>
